<compile_context>
chip_gen: v7x
topology: tpu7x:2x2x1
jax: 0.10.0
libtpu: 0.0.40
codegen_flags: <defaults>
</compile_context>

<pallas_src>
import functools
import math

import jax
import jax.numpy as jnp
from jax.experimental import pallas as pl
from jax.experimental.pallas import tpu as pltpu

DROPOUT_P = 0.5


def _round_up(x, m):
    return (x + m - 1) // m * m


def cnn_kernel(x_ref, w_ref, b_ref, out_ref, *, C, N):
    # x_ref:   (TB, C*N + C)  flattened points [c*N + n] followed by C pre-scaled
    #                         dropout keep-mask lanes (values in {0, 1/(1-p)})
    # w_ref:   (C, n_out)     linear weight stored as (in, out)
    # b_ref:   (1, n_out)     linear bias
    # out_ref: (TB, n_out)
    x = x_ref[...]                       # f32 (TB, C*N + C)
    w = w_ref[...]                       # f32 (C, n_out)

    acc = jnp.broadcast_to(b_ref[...], out_ref.shape).astype(jnp.float32)
    for c in range(C):                   # C == 3: fully unrolled VPU FMAs
        # max over this channel's N lanes (XLU cross-lane reduction)
        pooled_c = jnp.max(x[:, c * N:(c + 1) * N], axis=-1, keepdims=True)   # (TB, 1)
        keep_c = x[:, C * N + c: C * N + c + 1]                               # (TB, 1)
        acc = acc + (pooled_c * keep_c) * w[c:c + 1, :]                       # (TB, n_out)

    out_ref[...] = acc.astype(out_ref.dtype)


def _vmem_budget_bytes():
    # Per-TensorCore VMEM differs across generations (v5e/v6e: 128 MiB,
    # v7x: 64 MiB).  Use half the physical capacity, capped at 48 MiB.
    try:
        cap = pltpu.get_tpu_info().vmem_capacity_bytes
    except Exception:
        cap = 64 * 2**20          # conservative (v7x)
    return min(cap // 2, 48 * 2**20)


def _choose_tb(B, row_in_bytes, row_out_bytes, resident_bytes, budget):
    # Largest multiple-of-8 batch tile that (a) fits the double-buffered VMEM
    # budget and (b) leaves at least 2 grid steps (v7x megacore + pipelining).
    avail = max(budget - resident_bytes, 16 * (row_in_bytes + row_out_bytes))
    cap_vmem = avail // (2 * (row_in_bytes + row_out_bytes))
    cap_grid = max(8, (_round_up(B, 8) // 2) // 8 * 8)
    tb = 8
    for cand in (1024, 512, 256, 128, 64, 32, 16, 8):
        if cand <= cap_vmem and cand <= cap_grid:
            tb = cand
            break
    return tb


def cnn_forward(x, mask, w, b):
    # x: (B, C, N) f32; mask: (B, C) pre-scaled keep mask; w: (C, n_out); b: (1, n_out)
    B, C, N = x.shape
    n_out = w.shape[1]
    L = C * N + C                                    # packed row length

    # --- lane-dense packed input: [flattened points | pre-scaled mask] -------
    x_packed = jnp.concatenate(
        [x.reshape(B, C * N).astype(jnp.float32), mask.astype(jnp.float32)], axis=-1)

    # --- padding-aware VMEM accounting & tile choice --------------------------
    lane_in = _round_up(L, 128)
    lane_out = _round_up(n_out, 128)
    row_in_bytes = lane_in * 4
    row_out_bytes = lane_out * 4
    resident_bytes = (_round_up(C, 8) + 8) * lane_out * 4 * 2   # w + b (buffered)

    budget = _vmem_budget_bytes()
    TB = _choose_tb(B, row_in_bytes, row_out_bytes, resident_bytes, budget)

    # pad batch to a multiple of TB and to at least 2 tiles (grid >= 2)
    B_pad = max(_round_up(B, TB), 2 * TB)
    if B_pad != B:
        x_packed = jnp.pad(x_packed, ((0, B_pad - B), (0, 0)))
    grid = (B_pad // TB,)

    vmem_need = 2 * TB * (row_in_bytes + row_out_bytes) + resident_bytes
    vmem_limit = int(min(48 * 2**20, max(4 * 2**20, 2 * vmem_need)))

    flops = B_pad * C * N + 2 * B_pad * C * n_out
    bytes_accessed = 4 * (B_pad * L + B_pad * n_out + C * n_out + n_out)

    kernel = functools.partial(cnn_kernel, C=C, N=N)

    out = pl.pallas_call(
        kernel,
        out_shape=jax.ShapeDtypeStruct((B_pad, n_out), jnp.float32),
        grid_spec=pltpu.PrefetchScalarGridSpec(
            num_scalar_prefetch=0,
            grid=grid,
            in_specs=[
                pl.BlockSpec((TB, L), lambda i: (i, 0)),        # packed x + mask tile
                pl.BlockSpec((C, n_out), lambda i: (0, 0)),     # weight (resident)
                pl.BlockSpec((1, n_out), lambda i: (0, 0)),     # bias   (resident)
            ],
            out_specs=pl.BlockSpec((TB, n_out), lambda i: (i, 0)),
        ),
        compiler_params=pltpu.CompilerParams(
            dimension_semantics=("parallel",),
            vmem_limit_bytes=vmem_limit,
        ),
        cost_estimate=pl.CostEstimate(
            flops=flops, transcendentals=0, bytes_accessed=bytes_accessed),
    )(x_packed, w, b)

    return out[:B]


def cnn_ref(x, mask, w, b):
    # pure-JAX reference for sanity checking
    pooled = jnp.max(x.astype(jnp.float32), axis=-1)
    dropped = pooled * mask
    return dropped @ w + b


def init_params(key, c_in, n_out):
    kw, kb = jax.random.split(key)
    bound = 1.0 / math.sqrt(c_in)   # torch nn.Linear default init bound
    w = jax.random.uniform(kw, (c_in, n_out), jnp.float32, -bound, bound)
    b = jax.random.uniform(kb, (1, n_out), jnp.float32, -bound, bound)
    return w, b


if __name__ == "__main__":
    key = jax.random.PRNGKey(0)
    k_x, k_mask, k_par = jax.random.split(key, 3)

    # CNN.forward implies x of shape (B, 3, N): max over N, then Linear(3, n_out)
    B, C, N, n_out = 2, 3, 16, 40

    x = jax.random.normal(k_x, (B, C, N), jnp.float32)

    # training-mode dropout mask (p=0.5), pre-scaled by 1/(1-p)
    keep = jax.random.bernoulli(k_mask, 1.0 - DROPOUT_P, (B, C))
    mask = keep.astype(jnp.float32) / (1.0 - DROPOUT_P)

    w, b = init_params(k_par, C, n_out)

    out = cnn_forward(x, mask, w, b)
    out = jax.block_until_ready(out)

    ref = cnn_ref(x, mask, w, b)
    assert out.shape == (B, n_out)
    assert jnp.allclose(out, ref, atol=1e-5, rtol=1e-5)

    print("KERNEL_OK")
</pallas_src>

<mosaic_0001>
module attributes {stable_mosaic.version = 11 : i64} {
  func.func @cnn_kernel(%arg0: i32, %arg1: memref<8x51xf32, #tpu.memory_space<vmem>>, %arg2: memref<3x40xf32, #tpu.memory_space<vmem>>, %arg3: memref<1x40xf32, #tpu.memory_space<vmem>>, %arg4: memref<8x40xf32, #tpu.memory_space<vmem>>) attributes {dimension_semantics = [#tpu.dimension_semantics<parallel>], iteration_bounds = array<i64: 2>, scalar_prefetch = 0 : i64, scratch_operands = 0 : i64, tpu.core_type = #tpu.core_type<tc>, window_params = [{transform_indices = @transform_0, window_bounds = array<i64: 8, 51>}, {pipeline_mode = #tpu.pipeline_mode<synchronous>, transform_indices = @transform_1, window_bounds = array<i64: 3, 40>}, {pipeline_mode = #tpu.pipeline_mode<synchronous>, transform_indices = @transform_2, window_bounds = array<i64: 1, 40>}, {transform_indices = @transform_3, window_bounds = array<i64: 8, 40>}]} {
    %c0 = arith.constant 0 : index
    %c0_0 = arith.constant 0 : index
    %0 = vector.load %arg1[%c0, %c0_0] : memref<8x51xf32, #tpu.memory_space<vmem>>, vector<8x51xf32>
    %c0_1 = arith.constant 0 : index
    %c0_2 = arith.constant 0 : index
    %1 = vector.load %arg2[%c0_1, %c0_2] : memref<3x40xf32, #tpu.memory_space<vmem>>, vector<3x40xf32>
    %c0_3 = arith.constant 0 : index
    %c0_4 = arith.constant 0 : index
    %2 = vector.load %arg3[%c0_3, %c0_4] : memref<1x40xf32, #tpu.memory_space<vmem>>, vector<1x40xf32>
    %3 = vector.shape_cast %2 : vector<1x40xf32> to vector<1x40xf32>
    %4 = vector.broadcast %3 : vector<1x40xf32> to vector<8x40xf32>
    %5 = vector.extract_strided_slice %0 {offsets = [0, 0], sizes = [8, 16], strides = [1, 1]} : vector<8x51xf32> to vector<8x16xf32>
    %cst = arith.constant dense<0xFF800000> : vector<8xf32>
    %6 = vector.multi_reduction <maximumf>, %5, %cst [1] : vector<8x16xf32> to vector<8xf32>
    %7 = vector.shape_cast %6 : vector<8xf32> to vector<8x1xf32>
    %8 = vector.extract_strided_slice %0 {offsets = [0, 48], sizes = [8, 1], strides = [1, 1]} : vector<8x51xf32> to vector<8x1xf32>
    %9 = arith.mulf %7, %8 : vector<8x1xf32>
    %10 = vector.extract_strided_slice %1 {offsets = [0, 0], sizes = [1, 40], strides = [1, 1]} : vector<3x40xf32> to vector<1x40xf32>
    %11 = vector.broadcast %9 : vector<8x1xf32> to vector<8x40xf32>
    %12 = vector.broadcast %10 : vector<1x40xf32> to vector<8x40xf32>
    %13 = arith.mulf %11, %12 : vector<8x40xf32>
    %14 = arith.addf %4, %13 : vector<8x40xf32>
    %15 = vector.extract_strided_slice %0 {offsets = [0, 16], sizes = [8, 16], strides = [1, 1]} : vector<8x51xf32> to vector<8x16xf32>
    %cst_5 = arith.constant dense<0xFF800000> : vector<8xf32>
    %16 = vector.multi_reduction <maximumf>, %15, %cst_5 [1] : vector<8x16xf32> to vector<8xf32>
    %17 = vector.shape_cast %16 : vector<8xf32> to vector<8x1xf32>
    %18 = vector.extract_strided_slice %0 {offsets = [0, 49], sizes = [8, 1], strides = [1, 1]} : vector<8x51xf32> to vector<8x1xf32>
    %19 = arith.mulf %17, %18 : vector<8x1xf32>
    %20 = vector.extract_strided_slice %1 {offsets = [1, 0], sizes = [1, 40], strides = [1, 1]} : vector<3x40xf32> to vector<1x40xf32>
    %21 = vector.broadcast %19 : vector<8x1xf32> to vector<8x40xf32>
    %22 = vector.broadcast %20 : vector<1x40xf32> to vector<8x40xf32>
    %23 = arith.mulf %21, %22 : vector<8x40xf32>
    %24 = arith.addf %14, %23 : vector<8x40xf32>
    %25 = vector.extract_strided_slice %0 {offsets = [0, 32], sizes = [8, 16], strides = [1, 1]} : vector<8x51xf32> to vector<8x16xf32>
    %cst_6 = arith.constant dense<0xFF800000> : vector<8xf32>
    %26 = vector.multi_reduction <maximumf>, %25, %cst_6 [1] : vector<8x16xf32> to vector<8xf32>
    %27 = vector.shape_cast %26 : vector<8xf32> to vector<8x1xf32>
    %28 = vector.extract_strided_slice %0 {offsets = [0, 50], sizes = [8, 1], strides = [1, 1]} : vector<8x51xf32> to vector<8x1xf32>
    %29 = arith.mulf %27, %28 : vector<8x1xf32>
    %30 = vector.extract_strided_slice %1 {offsets = [2, 0], sizes = [1, 40], strides = [1, 1]} : vector<3x40xf32> to vector<1x40xf32>
    %31 = vector.broadcast %29 : vector<8x1xf32> to vector<8x40xf32>
    %32 = vector.broadcast %30 : vector<1x40xf32> to vector<8x40xf32>
    %33 = arith.mulf %31, %32 : vector<8x40xf32>
    %34 = arith.addf %24, %33 : vector<8x40xf32>
    %c0_7 = arith.constant 0 : index
    %c0_8 = arith.constant 0 : index
    %35 = vector.load %arg4[%c0_7, %c0_8] : memref<8x40xf32, #tpu.memory_space<vmem>>, vector<8x40xf32>
    tpu.vector_store %arg4[%c0_7, %c0_8], %34 {strides = array<i32>} : memref<8x40xf32, #tpu.memory_space<vmem>>, vector<8x40xf32>,
    return
  }
  func.func @transform_0(%arg0: i32) -> (i32, i32) {
    %c0_i32 = arith.constant 0 : i32
    %c0_i32_0 = arith.constant 0 : i32
    return %arg0, %c0_i32 : i32, i32
  }
  func.func @transform_1(%arg0: i32) -> (i32, i32) {
    %c0_i32 = arith.constant 0 : i32
    %c0_i32_0 = arith.constant 0 : i32
    %c0_i32_1 = arith.constant 0 : i32
    return %c0_i32, %c0_i32_0 : i32, i32
  }
  func.func @transform_2(%arg0: i32) -> (i32, i32) {
    %c0_i32 = arith.constant 0 : i32
    %c0_i32_0 = arith.constant 0 : i32
    %c0_i32_1 = arith.constant 0 : i32
    return %c0_i32, %c0_i32_0 : i32, i32
  }
  func.func @transform_3(%arg0: i32) -> (i32, i32) {
    %c0_i32 = arith.constant 0 : i32
    %c0_i32_0 = arith.constant 0 : i32
    return %arg0, %c0_i32 : i32, i32
  }
}

</mosaic_0001>

<bundles_post_ra>
// kernel: tpu_custom_call.1
= control target key start
LH: loop header
LB: loop body
LE: loop exit
PB: predicated region body
PF: predicated region fallthrough
CT: control target
= control target key end

     0   :  { %8 = vsyncpa [#allocation3], 0  ;;  %s795_s0 = inlined_call_operand.hbm [shape: f32[16,51], index: 0, kind: input, shape index: {}]   ;;  %s796_s1 = inlined_call_operand.hbm [shape: f32[3,40], index: 1, kind: input, shape index: {}]   ;;  %s797_s2 = inlined_call_operand.vmem [shape: f32[1,40], index: 2, kind: input, shape index: {}]   ;;  %s798_s3 = inlined_call_operand.hbm [shape: f32[16,40], index: 3, kind: output, shape index: {}]  }
   0x1   :  { %10 = vsyncpa [#allocation3 + $0x1], 0 }
   0x2   :  { %11 = vsyncpa [#allocation6], 0 }
   0x3   :  { %12 = vsyncpa [#allocation4], 0 }
   0x4   :  { %14 = vsyncpa [#allocation4 + $0x1], 0  ;;  %s587_s12 = smov 0   ;;  %s589_s13 = smov 0  }
   0x5   :  { %s591_s14 = smov 0   ;;  %s593_s15 = smov 0  }
   0x6 LB: > { %s608_s16 = sadd.s32 4294967295, %s559_s15   ;;  %s352_s17 = sadd.s32 4294967294, %s559_s15   ;;  %s559_s15 = sphi %s593_s15, %s822_s15   ;;  %s555_s14 = sphi %s591_s14, %s821_s14   ;;  %s551_s13 = sphi %s589_s13, %s820_s13   ;;  %s547_s12 = sphi %s587_s12, %s819_s12  }
   0x7   : > { %p40_p0 = scmp.ne.s32.totalorder %s551_s13, %s547_s12  ;;  %p799_p1 = scmp.eq.s32.totalorder %s608_s16, 0 }
   0x8   : > { %p112_p3 = scmp.eq.s32.totalorder %s352_s17, 1  ;;  %p353_p5 = scmp.ge.s32.totalorder %s559_s15, 1 }
   0x9   : > { %p617_p4 = por %p799_p1, %p40_p0  ;;  %p119_p7 = scmp.lt.s32.totalorder %s559_s15, 3 }
   0xa   : > { %p622_p6 = por %p112_p3, %p40_p0  ;;  %s561_s21 = smov [#allocation5]  }
   0xb   : > { %s802_s18 = scalar_select %p617_p4, 1, 0 }
   0xc   : > { %s803_s19 = scalar_select %p622_p6, 1, 0 }
   0xd   : > { %p627_p8 = pnand %p353_p5, %p119_p7  ;;  %s132_s22 = sshll.u32 %s561_s21, 4  ;;  %s133_s22 = int_to_ptr.vmem [resolvable:$true] %s132_s22 }
   0xe   : > { %s635_s23 = sadd.s32 1, %s559_s15   ;;  %s27_s27 = sadd.s32 1, %s555_s14 }
   0xf   : > { %s804_s20 = scalar_select %p627_p8, 1, 0 }
  0x10   : > { %p375_p10 = pneg %p627_p8  ;;  %s24_s25 = ssub.s32 %s559_s15, %s635_s23 }
  0x11   : > { %p645_p12 = scmp.eq.s32.totalorder %s24_s25, 0  ;;  %s431_s30 = scalar_lea.hbm %s796_s1, 64 }
  0x12   : > { %p639_p11 = pnand %p375_p10, %p799_p1  ;;  %p432_p0 = scmp.ne.s32.totalorder %s796_s1, %s431_s30 }
  0x13   : > { %s806_s26 = scalar_select %p645_p12, 1, 0 }
  0x14   : > { %p433_p3 = pneg %p639_p11  ;;  %p438_p10 = scmp.lt.u32.totalorder %s431_s30, %s796_s1 }
  0x16   : > { %p434_p5 = pnand %p433_p3, %p432_p0 }
  0x18   : > { %p435_p7 = pneg %p434_p5 }
  0x1a   : > { %p440_p9 = pnand %p438_p10, %p435_p7 }
  0x1c   : > { %443 = shalt.err (!%p440_p9)
}
  0x1d   : > { %s444_s8 = scalar_lea.vmem %s133_s22, 64  ;;  %p452_p6 = scmp.lt.s32.totalorder %s133_s22, %s133_s22 }
  0x1e   : > { %p445_p1 = scmp.ne.s32.totalorder %s133_s22, %s444_s8  ;;  %p453_p4 = scmp.lt.s32.totalorder %s444_s8, %s444_s8 }
  0x20   : > { %p447_p2 = pnand %p445_p1, %p433_p3  ;;  %p454_p8 = por %p453_p4, %p452_p6 }
  0x22   : > { %p448_p13 = pneg %p447_p2 }
  0x24   : > { %p455_p12 = pnand %p454_p8, %p448_p13 }
  0x26   : > { %458 = shalt.err (!%p455_p12)
}
  0x27   : > { %378 = dma.hbm_to_vmem [thread:$0]  (!%p639_p11), %s796_s1, 64, %s133_s22, [#allocation6]  }
  0x28   : > { %p807_p1 = scmp.ne.s32.totalorder %s806_s26, 0  ;;  %p35_p2 = scmp.eq.s32.totalorder %s559_s15, 0 }
  0x29   : > { %p808_p4 = scmp.ne.s32.totalorder %s555_s14, %s551_s13  ;;  %p809_p6 = scmp.eq.s32.totalorder %s608_s16, 1 }
  0x2a   : > { %s671_s11 = scalar_select %p807_p1, %s555_s14, %s27_s27  }
  0x2b   : > { %p679_p8 = por %p809_p6, %p808_p4  ;;  %p388_p9 = scmp.lt.s32.totalorder %s559_s15, 2 }
  0x2c   : > { %s146_s21 = sand.u32 1, %s555_s14   ;;  %p811_p12 = pmov %p808_p4 }
  0x2d   : > { %s356_s24 = sshll.u32 %s146_s21, 3  ;;  %s357_s25 = sshll.u32 %s559_s15, 7 }
  0x2e   : > { %p36_p13 = por %p35_p2, %p811_p12  ;;  %s692_s22 = scalar_lea.hbm %s795_s0, %s357_s25 }
  0x2f   : > { %s150_s26 = scalar_lea.vmem [#allocation2], %s356_s24  ;;  %s147_s4 = scalar_lea.sflag [#allocation3], %s146_s21 }
  0x30   : > { %s157_s27 = sshll.u32 %s150_s26, 4  ;;  %p694_p11 = pnand %p388_p9, %p36_p13  ;;  %s698_s27 = int_to_ptr.vmem [resolvable:$true] %s157_s27 }
  0x31   : > { %s459_s5 = scalar_lea.hbm %s692_s22, 128  ;;  %s464_s8 = scalar_lea.hbm %s795_s0, 256 }
  0x32   : > { %p460_p0 = scmp.ne.s32.totalorder %s692_s22, %s459_s5  ;;  %p461_p3 = pneg %p694_p11 }
  0x33   : > { %p465_p10 = scmp.lt.u32.totalorder %s692_s22, %s795_s0  ;;  %p466_p1 = scmp.lt.u32.totalorder %s464_s8, %s459_s5 }
  0x34   : > { %p462_p5 = pnand %p461_p3, %p460_p0  ;;  %p468_p4 = scmp.lt.u32.totalorder %s459_s5, %s692_s22 }
  0x35   : > { %p467_p2 = por %p466_p1, %p465_p10 }
  0x36   : > { %p463_p7 = pneg %p462_p5 }
  0x37   : > { %p469_p6 = por %p468_p4, %p467_p2 }
  0x39   : > { %p470_p9 = pnand %p469_p6, %p463_p7 }
  0x3b   : > { %473 = shalt.err (!%p470_p9)
}
  0x3c   : > { %s474_s21 = scalar_lea.vmem %s698_s27, 128  ;;  %s562_s24 = smov [#allocation2]  }
  0x3d   : > { %p475_p12 = scmp.ne.s32.totalorder %s698_s27, %s474_s21  ;;  %s479_s25 = sshll.u32 %s562_s24, 4  ;;  %s480_s25 = int_to_ptr.vmem [resolvable:$false] %s479_s25 }
  0x3e   : > { %s481_s28 = scalar_lea.vmem %s480_s25, 256  ;;  %p482_p5 = scmp.lt.s32.totalorder %s698_s27, %s480_s25 }
  0x3f   : > { %p477_p13 = pnand %p475_p12, %p461_p3  ;;  %p483_p10 = scmp.lt.s32.totalorder %s481_s28, %s474_s21 }
  0x41   : > { %p478_p0 = pneg %p477_p13  ;;  %p484_p1 = por %p483_p10, %p482_p5 }
  0x43   : > { %p485_p2 = pnand %p484_p1, %p478_p0 }
  0x45   : > { %488 = shalt.err (!%p485_p2)
}
  0x46   : > { %382 = dma.hbm_to_vmem [thread:$0]  (!%p694_p11), %s692_s22, 128, %s698_s27, %s147_s4  }
  0x47   : > { %p813_p7 = scmp.ne.s32.totalorder %s804_s20, 0 }
  0x48   : > { %s728_s29 = sand.u32 (!%p813_p7), 1, %s551_s13   ;;  %p814_p3 = scmp.ne.s32.totalorder (!%p813_p7), %s802_s18, 0 }
  0x49   : > { %166 = sbr.rel (%p813_p7) target bundleno = 382 (0x17e), region = 32  ;;  %s359_s26 = sshll.u32 (!%p813_p7), %s728_s29, 3 }
  0x4a   : > { %s169_s5 = scalar_lea.sflag (!%p813_p7), [#allocation3], %s728_s29  ;;  %s172_s6 = scalar_lea.vmem (!%p813_p7), [#allocation2], %s359_s26 }
  0x50   : > { %534 = dma.done.wait (%p814_p3), %s169_s5, 128  }
  0x51   : > { %536 = vsyncadd (%p814_p3), %s169_s5, 4294967168  ;;  %p815_p11 = scmp.eq.s32.totalorder %s608_s16, 0 }
  0x53   : > { %538 = dma.done.wait (%p815_p11), [#allocation6], 64   ;;  %p816_p4 = pmov %p815_p11 }
  0x54   : > { %vm208_vm0 = vcmask 130048   ;;  %vm240_vm1 = vcmask 392448   ;;  %v199_v0 = vld [vmem:[%s172_s6] sm:$0xff]  ;;  %vm224_vm2 = vcmask 261248   ;;  %v563_v4 = vmov 48   ;;  %s364_s22 = sshll.u32 %s608_s16, 7 }
  0x55   : > { %540 = vsyncadd (%p816_p4), [#allocation6], 4294967232  ;;  %v209_v1 = vsel %vm208_vm0, %v199_v0, -inf  ;;  %v241_v2 = vsel %vm240_vm1, %v199_v0, -inf  ;;  %v225_v3 = vsel %vm224_vm2, %v199_v0, -inf  ;;  %427 = vset.pattern.permute.xlu1 %v563_v4  ;;  %v564_v5 = vmov 49   ;;  %s751_s8 = scalar_lea.hbm %s798_s3, %s364_s22 }
  0x56   : > { %210 = vmax.xlane.f32.xlu0 %v209_v1  ;;  %242 = vmax.xlane.f32.xlu1 %v241_v2  ;;  %v565_v12 = vmov 50   ;;  %v218_v13 = vlaneseq  ;;  %v200_v16 = vld [vmem:[#allocation5] sm:$0x7]  ;;  %v362_v23 = vld [vmem:[%s797_s2] ss:$0 sm:$0xff]  ;;  %s198_s27 = scalar_lea.vmem [#allocation7], %s359_s26 }
  0x57   : > { %428 = vset.pattern.permute.xlu0 %v564_v5  ;;  %s272_s30 = sshll.u32 %s198_s27, 4  ;;  %vm256_vm3 = vcmask 326656   ;;  %s259_s9 = scalar_lea.sflag [#allocation4], %s728_s29  ;;  %s753_s30 = int_to_ptr.vmem [resolvable:$true] %s272_s30 }
  0x58   : > { %v219_v14 = vshrl.u32 %v218_v13, 7  ;;  %s489_s10 = scalar_lea.vmem %s753_s30, 128  ;;  %s566_s16 = smov [#allocation7]  }
  0x59   : > { %p490_p6 = scmp.ne.s32.totalorder %s753_s30, %s489_s10  ;;  %s493_s21 = sshll.u32 %s566_s16, 4  ;;  %s494_s21 = int_to_ptr.vmem [resolvable:$false] %s493_s21 }
  0x5a   : > { %226 = vmax.xlane.f32.xlu0 %v225_v3  ;;  %v220_v15 = vsub.s32 0, %v219_v14  ;;  %v236_v18 = vsub.s32 1, %v219_v14  ;;  %v252_v19 = vsub.s32 2, %v219_v14  ;;  %s495_s24 = scalar_lea.vmem %s494_s21, 256  ;;  %p496_p13 = scmp.lt.s32.totalorder %s753_s30, %s494_s21 }
  0x5b   : > { %p491_p9 = pnand %p490_p6, %p679_p8  ;;  %p497_p0 = scmp.lt.s32.totalorder %s495_s24, %s489_s10 }
  0x5c   : > { %v221_v17 = vrot.slane %v200_v16, %v220_v15  ;;  %v237_v22 = vrot.slane %v200_v16, %v236_v18  ;;  %v253_v24 = vrot.slane %v200_v16, %v252_v19 }
  0x5d   : > { %p492_p12 = pneg %p491_p9  ;;  %p498_p5 = por %p497_p0, %p496_p13 }
  0x5f   : > { %p499_p10 = pnand %p498_p5, %p492_p12 }
  0xe3   : > { %v211_v6 = vpop.xlane.xlu0 %210  ;;  %v243_v8 = vpop.xlane.xlu1 %242 }
  0xe4   : > { %v212_v7 = vmul.f32 %v211_v6, %v199_v0  ;;  %v244_v10 = vmul.f32 %v243_v8, %v199_v0 }
  0xe6   : > { %215 = vperm.xlu1 %427, %v212_v7  }
  0xe7   : > { %v227_v9 = vpop.xlane.xlu0 %226 }
  0xe8   : > { %v228_v11 = vmul.f32 %v227_v9, %v199_v0 }
  0xea   : > { %231 = vperm.xlu0 %428, %v228_v11   ;;  %429 = vset.pattern.permute.xlu1 %v565_v12 }
  0xeb   : > { %247 = vperm.xlu1 %429, %v244_v10  }
  0xee   : > { %430 = vset.pattern.permute.xlu0 %v565_v12 }
 0x165   : > { %v216_v20 = vpop.permute.xlu1 %215 }
 0x166   : > { %v222_v21 = vmul.f32 %v221_v17, %v216_v20 }
 0x168   : > { %v223_v26 = vadd.f32 %v362_v23, %v222_v21 }
 0x169   : > { %v232_v25 = vpop.permute.xlu0 %231 }
 0x16a   : > { %v238_v27 = vmul.f32 %v237_v22, %v232_v25  ;;  %v248_v28 = vpop.permute.xlu1 %247 }
 0x16b   : > { %v254_v29 = vmul.f32 %v253_v24, %v248_v28 }
 0x16c   : > { %v239_v30 = vadd.f32 %v238_v27, %v223_v26 }
 0x16e   : > { %v255_v31 = vadd.f32 %v254_v29, %v239_v30 }
 0x170   : > { %257 = vst.msk [vmem:[%s198_s27] sm:$0xff] %vm256_vm3, %v255_v31 }
 0x171   : > { %502 = shalt.err (!%p499_p10)
}
 0x172   : > { %s503_s25 = scalar_lea.hbm %s751_s8, 128  ;;  %s507_s26 = scalar_lea.hbm %s798_s3, 256 }
 0x173   : > { %p504_p1 = scmp.ne.s32.totalorder %s751_s8, %s503_s25  ;;  %p508_p3 = scmp.lt.u32.totalorder %s751_s8, %s798_s3 }
 0x174   : > { %p509_p11 = scmp.lt.u32.totalorder %s507_s26, %s503_s25  ;;  %p511_p6 = scmp.lt.u32.totalorder %s503_s25, %s751_s8 }
 0x175   : > { %p505_p2 = pnand %p504_p1, %p679_p8 }
 0x176   : > { %p510_p4 = por %p509_p11, %p508_p3 }
 0x177   : > { %p506_p7 = pneg %p505_p2 }
 0x178   : > { %p512_p9 = por %p511_p6, %p510_p4 }
 0x17a   : > { %p513_p12 = pnand %p512_p9, %p506_p7 }
 0x17c   : > { %516 = shalt.err (!%p513_p12)
}
 0x17d   : > { %373 = dma.vmem_to_hbm [thread:$0]  (%p679_p8), %s753_s30, 128, %s751_s8, %s259_s9  }
 0x17e PF: > { %s284_s18 = sand.u32 1, %s547_s12   ;;  %p817_p13 = scmp.ne.s32.totalorder %s803_s19, 0 }
 0x17f   : > { %p818_p0 = scmp.ge.s32.totalorder %s559_s15, 2  ;;  %s285_s20 = scalar_lea.sflag [#allocation4], %s284_s18 }
 0x181   : > { %p384_p5 = pnand %p818_p0, %p817_p13 }
 0x183   : > { %542 = dma.done.wait (!%p384_p5), %s285_s20, 128  }
 0x184   : > { %544 = vsyncadd (!%p384_p5), %s285_s20, 4294967168  ;;  %p17_p10 = scmp.ge.s32.totalorder %s635_s23, 4   ;;  %s819_s12 = smov %s551_s13 }
 0x185   : > { %s820_s13 = smov %s555_s14  ;;  %s821_s14 = smov %s671_s11 }
 0x186   : > { %s822_s15 = smov %s635_s23  ;;  %19 = sbr.rel (!%p17_p10) target bundleno = 6 (0x6), region = 81 }
 0x18d   :  { %290 = vsyncpa [#allocation3], 1 }
 0x18e   :  { %292 = vsyncpa [#allocation3 + $0x1], 1 }
 0x18f   :  { %293 = vsyncpa [#allocation6], 1 }
 0x190   :  { %294 = vsyncpa [#allocation4], 1 }
 0x191   :  { %296 = vsyncpa [#allocation4 + $0x1], 1 }

</bundles_post_ra>
